<compile_context>
chip_gen: v7x
topology: tpu7x:2x2x1
jax: 0.10.0
libtpu: 0.0.40
codegen_flags: <defaults>
</compile_context>

<pallas_src>
import functools

import jax
import jax.numpy as jnp
from jax.experimental import pallas as pl
from jax.experimental.pallas import tpu as pltpu


# ---------------------------------------------------------------------------
# Kernels
# ---------------------------------------------------------------------------

def _fused_repeat_kernel(x_ref, w_ref, b_ref, o_ref, act_ref, *, compute_dtype):
    """One (batch_tile, layer) grid step of the fused Linear+ReLU chain.

    x_ref:   (TB, IN)    input activations (read only at layer 0)
    w_ref:   (IN, OUT)   this layer's weight (already in compute_dtype)
    b_ref:   (1, OUT)    this layer's bias (f32)
    o_ref:   (TB, OUT)   final output tile (written only at the last layer)
    act_ref: (TB, OUT)   VMEM-resident activation carried across layer steps
    """
    layer = pl.program_id(1)

    @pl.when(layer == 0)
    def _init():
        act_ref[...] = x_ref[...].astype(jnp.float32)

    a = act_ref[...].astype(compute_dtype)
    y = jnp.dot(a, w_ref[...], preferred_element_type=jnp.float32)
    y = jnp.maximum(y + b_ref[...], 0.0)          # f32 epilogue (bias + ReLU)
    act_ref[...] = y

    @pl.when(layer == pl.num_programs(1) - 1)
    def _write():
        o_ref[...] = act_ref[...].astype(o_ref.dtype)


def _linear_relu_kernel(x_ref, w_ref, b_ref, o_ref, *, compute_dtype):
    """Single Linear(in, out) + ReLU (used for a first layer with in != hidden)."""
    y = jnp.dot(x_ref[...].astype(compute_dtype), w_ref[...],
                preferred_element_type=jnp.float32)
    o_ref[...] = jnp.maximum(y + b_ref[...], 0.0).astype(o_ref.dtype)


# ---------------------------------------------------------------------------
# pallas_call wrappers
# ---------------------------------------------------------------------------

def _pick_tile_b(batch):
    """Batch tile: multiple of 8, <= 256, and >= 2 tiles when batch allows
    (so both v7x TensorCores get work on the 'parallel' batch axis)."""
    rb = ((batch + 7) // 8) * 8
    tile = min(256, rb)
    if tile == rb and rb >= 16:
        tile = ((rb // 2 + 7) // 8) * 8
    return tile


def _pad_batch(x, tile_b):
    b = x.shape[0]
    bp = pl.cdiv(b, tile_b) * tile_b
    if bp != b:
        x = jnp.pad(x, ((0, bp - b), (0, 0)))
    return x, bp


def _fused_repeat_call(x, w_stack, b_stack, *, compute_dtype):
    """out = relu(...relu(relu(x @ W0 + b0) @ W1 + b1)... @ W_{N-1} + b_{N-1})."""
    batch, in_dim = x.shape
    n_layers, w_in, out_dim = w_stack.shape
    assert w_in == in_dim and in_dim == out_dim  # chained fused path

    tile_b = _pick_tile_b(batch)
    x_p, bp = _pad_batch(x, tile_b)
    grid = (bp // tile_b, n_layers)

    w_stack = w_stack.astype(compute_dtype)
    b_stack = b_stack.astype(jnp.float32)

    flops = 2 * bp * in_dim * out_dim * n_layers
    bytes_accessed = (x_p.size * x_p.dtype.itemsize
                      + w_stack.size * w_stack.dtype.itemsize
                      + b_stack.size * 4
                      + bp * out_dim * x_p.dtype.itemsize)

    out = pl.pallas_call(
        functools.partial(_fused_repeat_kernel, compute_dtype=compute_dtype),
        out_shape=jax.ShapeDtypeStruct((bp, out_dim), x.dtype),
        grid_spec=pltpu.PrefetchScalarGridSpec(
            num_scalar_prefetch=0,
            grid=grid,
            in_specs=[
                pl.BlockSpec((tile_b, in_dim), lambda i, l: (i, 0)),       # x tile
                pl.BlockSpec((None, in_dim, out_dim), lambda i, l: (l, 0, 0)),  # W_l
                pl.BlockSpec((None, 1, out_dim), lambda i, l: (l, 0, 0)),       # b_l
            ],
            out_specs=pl.BlockSpec((tile_b, out_dim), lambda i, l: (i, 0)),
            scratch_shapes=[pltpu.VMEM((tile_b, out_dim), jnp.float32)],
        ),
        compiler_params=pltpu.CompilerParams(
            dimension_semantics=("parallel", "arbitrary"),
        ),
        cost_estimate=pl.CostEstimate(flops=flops, transcendentals=0,
                                      bytes_accessed=bytes_accessed),
    )(x_p, w_stack, b_stack)
    return out[:batch] if bp != batch else out


def _linear_relu_call(x, w_t, b, *, compute_dtype):
    """y = relu(x @ w_t + b) for a single layer (used when in_features != hidden)."""
    batch, in_dim = x.shape
    out_dim = w_t.shape[1]

    tile_b = _pick_tile_b(batch)
    x_p, bp = _pad_batch(x, tile_b)

    out = pl.pallas_call(
        functools.partial(_linear_relu_kernel, compute_dtype=compute_dtype),
        out_shape=jax.ShapeDtypeStruct((bp, out_dim), x.dtype),
        grid_spec=pltpu.PrefetchScalarGridSpec(
            num_scalar_prefetch=0,
            grid=(bp // tile_b,),
            in_specs=[
                pl.BlockSpec((tile_b, in_dim), lambda i: (i, 0)),
                pl.BlockSpec((in_dim, out_dim), lambda i: (0, 0)),
                pl.BlockSpec((1, out_dim), lambda i: (0, 0)),
            ],
            out_specs=pl.BlockSpec((tile_b, out_dim), lambda i: (i, 0)),
        ),
        compiler_params=pltpu.CompilerParams(dimension_semantics=("parallel",)),
        cost_estimate=pl.CostEstimate(
            flops=2 * bp * in_dim * out_dim, transcendentals=0,
            bytes_accessed=(bp * in_dim + in_dim * out_dim + out_dim + bp * out_dim) * 4),
    )(x_p, w_t.astype(compute_dtype), b.astype(jnp.float32))
    return out[:batch] if bp != batch else out


# ---------------------------------------------------------------------------
# RepeatModule: params + forward
# ---------------------------------------------------------------------------

def init_repeat_module_params(key, in_features, hidden, n_layers, dtype=jnp.float32):
    """PyTorch-Linear-style init; weights pre-transposed to (in, out) and biases
    pre-reshaped to (1, out) so the forward path does zero layout fixup."""
    assert n_layers >= 1
    ws, bs = [], []
    fan_in = in_features
    for _ in range(n_layers):
        key, kw, kb = jax.random.split(key, 3)
        bound = 1.0 / (fan_in ** 0.5)
        w = jax.random.uniform(kw, (hidden, fan_in), dtype, -bound, bound)  # torch (out, in)
        b = jax.random.uniform(kb, (hidden,), dtype, -bound, bound)
        ws.append(jnp.transpose(w))            # (in, out)
        bs.append(b.reshape(1, hidden))        # (1, out)
        fan_in = hidden                        # RepeatModule chains in <- out

    params = {}
    if in_features != hidden:
        params["first"] = (ws[0], bs[0])       # odd-shaped first layer, kept separate
        ws, bs = ws[1:], bs[1:]
    else:
        params["first"] = None
    if ws:
        params["w_stack"] = jnp.stack(ws, axis=0)   # (Ns, hidden, hidden)
        params["b_stack"] = jnp.stack(bs, axis=0)   # (Ns, 1, hidden)
    else:
        params["w_stack"] = jnp.zeros((0, hidden, hidden), dtype)
        params["b_stack"] = jnp.zeros((0, 1, hidden), dtype)
    return params


@functools.partial(jax.jit, static_argnames=("compute_dtype",))
def repeat_module_forward(x, params, *, compute_dtype=jnp.float32):
    """RepeatModule.forward: sequential Linear+ReLU blocks, fused on-TPU."""
    out = x
    if params["first"] is not None:
        w_t, b = params["first"]
        out = _linear_relu_call(out, w_t, b, compute_dtype=compute_dtype)
    if params["w_stack"].shape[0] > 0:
        out = _fused_repeat_call(out, params["w_stack"], params["b_stack"],
                                 compute_dtype=compute_dtype)
    return out


def repeat_module_reference(x, params):
    """Plain-JAX reference (same math as the PyTorch module)."""
    out = x
    if params["first"] is not None:
        w_t, b = params["first"]
        out = jnp.maximum(out @ w_t + b, 0.0)
    for l in range(params["w_stack"].shape[0]):
        out = jnp.maximum(out @ params["w_stack"][l] + params["b_stack"][l], 0.0)
    return out


# ---------------------------------------------------------------------------
# Demo / self-check
# ---------------------------------------------------------------------------

if __name__ == "__main__":
    key = jax.random.PRNGKey(0)

    # Case A: in_features == hidden -> the whole N-layer chain is one pallas_call.
    B, IN, HIDDEN, N_LAYERS = 128, 128, 128, 3
    key, kx, kp = jax.random.split(key, 3)
    x = jax.random.normal(kx, (B, IN), dtype=jnp.float32)
    params = init_repeat_module_params(kp, IN, HIDDEN, N_LAYERS)

    out = jax.block_until_ready(
        repeat_module_forward(x, params, compute_dtype=jnp.float32))
    ref = repeat_module_reference(x, params)
    assert out.shape == (B, HIDDEN)
    assert jnp.allclose(out, ref, atol=1e-4, rtol=1e-4)

    # bf16 compute path (v6e/v7x MXU fast path), f32 accumulation + f32 epilogue.
    out_bf16 = jax.block_until_ready(
        repeat_module_forward(x, params, compute_dtype=jnp.bfloat16))
    err = float(jnp.max(jnp.abs(out_bf16 - ref)))
    assert err < 5e-2 * (1.0 + float(jnp.max(jnp.abs(ref))))

    # Case B: in_features != hidden and a non-multiple batch size
    # -> first layer via single-layer kernel, remaining layers fused; batch padded.
    B2, IN2, HID2, NL2 = 50, 64, 128, 3
    key, kx2, kp2 = jax.random.split(key, 3)
    x2 = jax.random.normal(kx2, (B2, IN2), dtype=jnp.float32)
    params2 = init_repeat_module_params(kp2, IN2, HID2, NL2)
    out2 = jax.block_until_ready(
        repeat_module_forward(x2, params2, compute_dtype=jnp.float32))
    ref2 = repeat_module_reference(x2, params2)
    assert out2.shape == (B2, HID2)
    assert jnp.allclose(out2, ref2, atol=1e-4, rtol=1e-4)

    print("KERNEL_OK")
</pallas_src>

<mosaic_0001>
module attributes {stable_mosaic.version = 11 : i64} {
  func.func @_fused_repeat_kernel(%arg0: i32, %arg1: i32, %arg2: memref<64x128xf32, #tpu.memory_space<vmem>>, %arg3: memref<1x128x128xf32, #tpu.memory_space<vmem>>, %arg4: memref<1x1x128xf32, #tpu.memory_space<vmem>>, %arg5: memref<64x128xf32, #tpu.memory_space<vmem>>, %arg6: memref<64x128xf32, #tpu.memory_space<vmem>>) attributes {dimension_semantics = [#tpu.dimension_semantics<parallel>, #tpu.dimension_semantics<arbitrary>], iteration_bounds = array<i64: 2, 3>, scalar_prefetch = 0 : i64, scratch_operands = 1 : i64, tpu.core_type = #tpu.core_type<tc>, window_params = [{transform_indices = @transform_0, window_bounds = array<i64: 64, 128>}, {transform_indices = @transform_1, window_bounds = array<i64: 1, 128, 128>}, {transform_indices = @transform_2, window_bounds = array<i64: 1, 1, 128>}, {transform_indices = @transform_3, window_bounds = array<i64: 64, 128>}]} {
    %c0_i32 = arith.constant 0 : i32
    %0 = arith.cmpi eq, %arg1, %c0_i32 : i32
    %1 = arith.extui %0 : i1 to i32
    %c0_i32_0 = arith.constant 0 : i32
    %2 = arith.cmpi ne, %1, %c0_i32_0 : i32
    scf.if %2 {
      %c0_12 = arith.constant 0 : index
      %c0_13 = arith.constant 0 : index
      %17 = vector.load %arg2[%c0_12, %c0_13] : memref<64x128xf32, #tpu.memory_space<vmem>>, vector<64x128xf32>
      %c0_14 = arith.constant 0 : index
      %c0_15 = arith.constant 0 : index
      %18 = vector.load %arg6[%c0_14, %c0_15] : memref<64x128xf32, #tpu.memory_space<vmem>>, vector<64x128xf32>
      tpu.vector_store %arg6[%c0_14, %c0_15], %17 {strides = array<i32>} : memref<64x128xf32, #tpu.memory_space<vmem>>, vector<64x128xf32>,
    } else {
    }
    %c0 = arith.constant 0 : index
    %c0_1 = arith.constant 0 : index
    %3 = vector.load %arg6[%c0, %c0_1] : memref<64x128xf32, #tpu.memory_space<vmem>>, vector<64x128xf32>
    %c0_2 = arith.constant 0 : index
    %c0_3 = arith.constant 0 : index
    %c0_4 = arith.constant 0 : index
    %4 = vector.load %arg3[%c0_2, %c0_3, %c0_4] : memref<1x128x128xf32, #tpu.memory_space<vmem>>, vector<1x128x128xf32>
    %5 = vector.shape_cast %4 : vector<1x128x128xf32> to vector<128x128xf32>
    %cst = arith.constant dense<0.000000e+00> : vector<64x128xf32>
    %6 = tpu.matmul %3, %5, %cst {dimension_numbers = #tpu.dot_dimension_numbers<[1], [0], [0], [1], [0, 0, 1, 1], [], []>} : vector<64x128xf32>, vector<128x128xf32>, vector<64x128xf32> -> vector<64x128xf32>
    %c0_5 = arith.constant 0 : index
    %c0_6 = arith.constant 0 : index
    %c0_7 = arith.constant 0 : index
    %7 = vector.load %arg4[%c0_5, %c0_6, %c0_7] : memref<1x1x128xf32, #tpu.memory_space<vmem>>, vector<1x1x128xf32>
    %8 = vector.shape_cast %7 : vector<1x1x128xf32> to vector<1x128xf32>
    %9 = vector.broadcast %8 : vector<1x128xf32> to vector<64x128xf32>
    %10 = arith.addf %6, %9 : vector<64x128xf32>
    %cst_8 = arith.constant 0.000000e+00 : f32
    %11 = vector.broadcast %cst_8 : f32 to vector<64x128xf32>
    %12 = arith.maximumf %10, %11 : vector<64x128xf32>
    %c0_9 = arith.constant 0 : index
    %c0_10 = arith.constant 0 : index
    %13 = vector.load %arg6[%c0_9, %c0_10] : memref<64x128xf32, #tpu.memory_space<vmem>>, vector<64x128xf32>
    tpu.vector_store %arg6[%c0_9, %c0_10], %12 {strides = array<i32>} : memref<64x128xf32, #tpu.memory_space<vmem>>, vector<64x128xf32>,
    %c2_i32 = arith.constant 2 : i32
    %14 = arith.cmpi eq, %arg1, %c2_i32 : i32
    %15 = arith.extui %14 : i1 to i32
    %c0_i32_11 = arith.constant 0 : i32
    %16 = arith.cmpi ne, %15, %c0_i32_11 : i32
    scf.if %16 {
      %c0_12 = arith.constant 0 : index
      %c0_13 = arith.constant 0 : index
      %17 = vector.load %arg6[%c0_12, %c0_13] : memref<64x128xf32, #tpu.memory_space<vmem>>, vector<64x128xf32>
      %c0_14 = arith.constant 0 : index
      %c0_15 = arith.constant 0 : index
      %18 = vector.load %arg5[%c0_14, %c0_15] : memref<64x128xf32, #tpu.memory_space<vmem>>, vector<64x128xf32>
      tpu.vector_store %arg5[%c0_14, %c0_15], %17 {strides = array<i32>} : memref<64x128xf32, #tpu.memory_space<vmem>>, vector<64x128xf32>,
    } else {
    }
    return
  }
  func.func @transform_0(%arg0: i32, %arg1: i32) -> (i32, i32) {
    %c0_i32 = arith.constant 0 : i32
    %c0_i32_0 = arith.constant 0 : i32
    return %arg0, %c0_i32 : i32, i32
  }
  func.func @transform_1(%arg0: i32, %arg1: i32) -> (i32, i32, i32) {
    %c0_i32 = arith.constant 0 : i32
    %c0_i32_0 = arith.constant 0 : i32
    %c0_i32_1 = arith.constant 0 : i32
    return %arg1, %c0_i32, %c0_i32_0 : i32, i32, i32
  }
  func.func @transform_2(%arg0: i32, %arg1: i32) -> (i32, i32, i32) {
    %c0_i32 = arith.constant 0 : i32
    %c0_i32_0 = arith.constant 0 : i32
    %c0_i32_1 = arith.constant 0 : i32
    return %arg1, %c0_i32, %c0_i32_0 : i32, i32, i32
  }
  func.func @transform_3(%arg0: i32, %arg1: i32) -> (i32, i32) {
    %c0_i32 = arith.constant 0 : i32
    %c0_i32_0 = arith.constant 0 : i32
    return %arg0, %c0_i32 : i32, i32
  }
}

</mosaic_0001>

<bundles_post_ra>
// kernel: repeat_module_forward.1
= control target key start
LH: loop header
LB: loop body
LE: loop exit
PB: predicated region body
PF: predicated region fallthrough
CT: control target
= control target key end

     0   :  { %s1403_s0 = inlined_call_operand.hbm [shape: f32[128,128], index: 0, kind: input, shape index: {}]   ;;  %s1404_s1 = inlined_call_operand.hbm [shape: f32[3,128,128], index: 1, kind: input, shape index: {}]   ;;  %s1405_s2 = inlined_call_operand.vmem [shape: f32[3,1,128], index: 2, kind: input, shape index: {}]   ;;  %s1406_s3 = inlined_call_operand.hbm [shape: f32[128,128], index: 3, kind: output, shape index: {}]  }
   0x1   :  { %1417 = sst [smem:[#allocation15_spill]] %s1403_s0 }
   0x2   :  { %8 = vsyncpa [#allocation4], 0 }
   0x3   :  { %10 = vsyncpa [#allocation4 + $0x1], 0 }
   0x4   :  { %11 = vsyncpa [#allocation7], 0 }
   0x5   :  { %13 = vsyncpa [#allocation7 + $0x1], 0 }
   0x6   :  { %14 = vsyncpa [#allocation5], 0 }
   0x7   :  { %16 = vsyncpa [#allocation5 + $0x1], 0  ;;  %s1046_s12 = smov 0   ;;  %s1048_s13 = smov 0  }
   0x8   :  { %s1050_s14 = smov 0   ;;  %s1052_s15 = smov 0  }
   0x9   :  { %s1054_s16 = smov 0   ;;  %s1056_s17 = smov 0  }
   0xa   :  { %s1058_s18 = smov 0   ;;  %s1060_s19 = smov 0  }
   0xb   :  { %s1062_s20 = smov 0   ;;  %s1064_s21 = smov 0  }
   0xc   :  { %s1066_s22 = smov 0  }
   0xd LB: > { %1418 = sst [smem:[#allocation12_spill]] %s989_s15  ;;  %s579_s23 = sadd.s32 4294967295, %s1017_s22   ;;  %s1017_s22 = sphi %s1066_s22, %s22_s22   ;;  %s1013_s21 = sphi %s1064_s21, %s1453_s21   ;;  %s1009_s20 = sphi %s1062_s20, %s1452_s20   ;;  %s1005_s19 = sphi %s1060_s19, %s1451_s19   ;;  %s1001_s18 = sphi %s1058_s18, %s1450_s18   ;;  %s997_s17 = sphi %s1056_s17, %s1449_s17   ;;  %s993_s16 = sphi %s1054_s16, %s1448_s16   ;;  %s989_s15 = sphi %s1052_s15, %s1447_s15   ;;  %s985_s14 = sphi %s1050_s14, %s1446_s14   ;;  %s981_s13 = sphi %s1048_s13, %s1445_s13   ;;  %s977_s12 = sphi %s1046_s12, %s1444_s12  }
   0xe   : > { %s580_s24 = sadd.s32 4294967294, %s1017_s22   ;;  %s34_s25 = sadd.s32 1, %s1013_s21 }
   0xf   : > { %p48_p0 = scmp.ne.s32.totalorder %s997_s17, %s993_s16  ;;  %p1408_p1 = scmp.eq.s32.totalorder %s1017_s22, 0 }
  0x10   : > { %p54_p2 = scmp.ne.s32.totalorder %s993_s16, %s989_s15  ;;  %p1110_p3 = scmp.eq.s32.totalorder %s579_s23, 0 }
  0x11   : > { %p1116_p4 = por %p1408_p1, %p48_p0  ;;  %p130_p5 = scmp.eq.s32.totalorder %s579_s23, 5 }
  0x12   : > { %p1122_p6 = por %p1110_p3, %p54_p2  ;;  %p136_p7 = scmp.eq.s32.totalorder %s580_s24, 5 }
  0x13   : > { %p1126_p8 = por %p130_p5, %p48_p0  ;;  %p1407_p10 = scmp.lt.s32.totalorder %s1017_s22, 6 }
  0x14   : > { %s1421_s29 = scalar_select %p1122_p6, 1, 0 }
  0x15   : > { %s1422_s30 = scalar_select %p1126_p8, 1, 0 }
  0x16   : > { %p1130_p9 = por %p136_p7, %p54_p2  ;;  %s156_s5 = sand.u32 1, %s997_s17  }
  0x17   : > { %s601_s6 = sshll.u32 %s1013_s21, 10  ;;  %s583_s7 = sshll.u32 %s156_s5, 6 }
  0x18   : > { %s1423_s4 = scalar_select %p1130_p9, 1, 0 }
  0x19   : > { %s1425_s0 = sld [smem:[#allocation15_spill]]  ;;  %s160_s11 = scalar_lea.vmem [#allocation3], %s583_s7 }
  0x1a   : > { %1424 = sst [smem:[#allocation13_spill]] %s1423_s4  ;;  %s167_s23 = sshll.u32 %s160_s11, 4  ;;  %s1150_s23 = int_to_ptr.vmem [resolvable:$true] %s167_s23 }
  0x1b   : > { %p1146_p11 = pnand %p1407_p10, %p1116_p4  ;;  %s1152_s26 = scalar_lea.sflag [#allocation4], %s156_s5 }
  0x1d   : > { %p833_p13 = pneg %p1146_p11 }
  0x1f   : > { %s1140_s10 = scalar_lea.hbm %s1425_s0, %s601_s6  ;;  %s836_s8 = scalar_lea.hbm %s1425_s0, 2048 }
  0x20   : > { %s831_s6 = scalar_lea.hbm %s1140_s10, 1024  ;;  %p837_p4 = scmp.lt.u32.totalorder %s1140_s10, %s1425_s0 }
  0x21   : > { %p832_p12 = scmp.ne.s32.totalorder %s1140_s10, %s831_s6  ;;  %p838_p5 = scmp.lt.u32.totalorder %s836_s8, %s831_s6 }
  0x22   : > { %p840_p10 = scmp.lt.u32.totalorder %s831_s6, %s1140_s10 }
  0x23   : > { %p834_p0 = pnand %p833_p13, %p832_p12  ;;  %p839_p7 = por %p838_p5, %p837_p4 }
  0x25   : > { %p835_p2 = pneg %p834_p0  ;;  %p841_p1 = por %p840_p10, %p839_p7 }
  0x27   : > { %p842_p9 = pnand %p841_p1, %p835_p2 }
  0x29   : > { %845 = shalt.err (!%p842_p9)
}
  0x2a   : > { %s846_s5 = scalar_lea.vmem %s1150_s23, 1024  ;;  %s1019_s28 = smov [#allocation3]  }
  0x2b   : > { %p847_p12 = scmp.ne.s32.totalorder %s1150_s23, %s846_s5  ;;  %s851_s7 = sshll.u32 %s1019_s28, 4  ;;  %s852_s7 = int_to_ptr.vmem [resolvable:$false] %s851_s7 }
  0x2c   : > { %s853_s9 = scalar_lea.vmem %s852_s7, 2048  ;;  %p854_p6 = scmp.lt.s32.totalorder %s1150_s23, %s852_s7 }
  0x2d   : > { %p849_p0 = pnand %p847_p12, %p833_p13  ;;  %p855_p4 = scmp.lt.s32.totalorder %s853_s9, %s846_s5 }
  0x2f   : > { %p850_p8 = pneg %p849_p0  ;;  %p856_p5 = por %p855_p4, %p854_p6 }
  0x31   : > { %p857_p10 = pnand %p856_p5, %p850_p8 }
  0x33   : > { %860 = shalt.err (!%p857_p10)
}
  0x34   : > { %s1411_s6 = smov 128   ;;  %s1412_s8 = smov 8  }
  0x35   : > { %729 = dma.hbm_to_vmem [thread:$0]  (!%p1146_p11), %s1140_s10, 1024, %s1150_s23, %s1152_s26, %s1411_s6, %s1411_s6, %s1412_s8  }
  0x36   : > { %p589_p1 = scmp.ge.s32.totalorder %s1017_s22, 1  ;;  %p202_p6 = scmp.lt.s32.totalorder %s1017_s22, 7 }
  0x37   : > { %s31_s5 = sadd.s32 1, %s1009_s20  ;;  %s67_s28 = sadd.s32 1, %s985_s14 }
  0x38   : > { %p1185_p8 = pnand %p589_p1, %p202_p6  ;;  %p32_p9 = scmp.ge.s32.totalorder %s31_s5, 3 }
  0x39   : > { %p74_p13 = scmp.ne.s32.totalorder %s985_s14, %s981_s13  ;;  %p80_p2 = scmp.ne.s32.totalorder %s981_s13, %s977_s12 }
  0x3a   : > { %s1455_s5 = smov (%p32_p9, %s31_s5), 0  ;;  %s1457_s25 = smov (!%p32_p9, %s34_s25), %s1013_s21 }
  0x3b   : > { %1428 = sst [smem:[#allocation14_spill]] %s1455_s5  ;;  %s64_s26 = ssub.s32 %s1009_s20, %s1455_s5 }
  0x3c   : > { %p1429_p11 = scmp.eq.s32.totalorder %s1017_s22, 0  ;;  %p36_p12 = scmp.ge.s32.totalorder %s1457_s25, 2 }
  0x3d   : > { %p65_p0 = scmp.eq.s32.totalorder %s64_s26, 0  ;;  %p1210_p4 = por %p80_p2, %p1110_p3 }
  0x3e   : > { %p1204_p7 = por %p74_p13, %p1429_p11  ;;  %s177_s12 = sand.u32 1, %s985_s14  }
  0x3f   : > { %s1431_s23 = scalar_select %p1210_p4, 1, 0 }
  0x40   : > { %s1459_s25 = smov (%p36_p12, %s1457_s25), 0  ;;  %s586_s9 = sshll.u32 %s177_s12, 7 }
  0x41   : > { %s1218_s24 = scalar_select %p65_p0, %s985_s14, %s67_s28  }
  0x42   : > { %s38_s7 = ssub.s32 %s1013_s21, %s1459_s25  ;;  %s602_s6 = sshll.u32 %s1009_s20, 11 }
  0x43   : > { %p39_p5 = scmp.eq.s32.totalorder %s38_s7, 0  ;;  %s1432_s8 = sadd.s32 1, %s997_s17 }
  0x44   : > { %s1231_s27 = scalar_lea.hbm %s1404_s1, %s602_s6  ;;  %s181_s4 = scalar_lea.vmem [#allocation6], %s586_s9 }
  0x45   : > { %s1226_s0 = scalar_select %p39_p5, %s997_s17, %s1432_s8  }
  0x46   : > { %s188_s15 = sshll.u32 %s181_s4, 4  ;;  %p1433_p3 = scmp.lt.s32.totalorder %s1017_s22, 6  ;;  %s1233_s15 = int_to_ptr.vmem [resolvable:$true] %s188_s15 }
  0x47   : > { %s1243_s8 = scalar_lea.sflag [#allocation7], %s177_s12  ;;  %s861_s6 = scalar_lea.hbm %s1231_s27, 2048 }
  0x48   : > { %p1239_p10 = pnand %p1433_p3, %p1204_p7  ;;  %p862_p1 = scmp.ne.s32.totalorder %s1231_s27, %s861_s6 }
  0x49   : > { %s866_s10 = scalar_lea.hbm %s1404_s1, 6144  ;;  %p867_p2 = scmp.lt.u32.totalorder %s1231_s27, %s1404_s1 }
  0x4a   : > { %p863_p6 = pneg %p1239_p10  ;;  %p868_p11 = scmp.lt.u32.totalorder %s866_s10, %s861_s6 }
  0x4b   : > { %p870_p12 = scmp.lt.u32.totalorder %s861_s6, %s1231_s27 }
  0x4c   : > { %p864_p9 = pnand %p863_p6, %p862_p1  ;;  %p869_p7 = por %p868_p11, %p867_p2 }
  0x4e   : > { %p865_p13 = pneg %p864_p9  ;;  %p871_p0 = por %p870_p12, %p869_p7 }
  0x50   : > { %p872_p5 = pnand %p871_p0, %p865_p13 }
  0x52   : > { %875 = shalt.err (!%p872_p5)
}
  0x53   : > { %s876_s12 = scalar_lea.vmem %s1233_s15, 2048  ;;  %s1022_s26 = smov [#allocation6]  }
  0x54   : > { %p877_p3 = scmp.ne.s32.totalorder %s1233_s15, %s876_s12  ;;  %s881_s4 = sshll.u32 %s1022_s26, 4  ;;  %s882_s4 = int_to_ptr.vmem [resolvable:$false] %s881_s4 }
  0x55   : > { %s883_s5 = scalar_lea.vmem %s882_s4, 4096  ;;  %p884_p4 = scmp.lt.s32.totalorder %s1233_s15, %s882_s4 }
  0x56   : > { %p879_p1 = pnand %p877_p3, %p863_p6  ;;  %p885_p2 = scmp.lt.s32.totalorder %s883_s5, %s876_s12 }
  0x58   : > { %p880_p9 = pneg %p879_p1  ;;  %p886_p11 = por %p885_p2, %p884_p4 }
  0x5a   : > { %p887_p7 = pnand %p886_p11, %p880_p9 }
  0x5c   : > { %890 = shalt.err (!%p887_p7)
}
  0x5d   : > { %s1435_s6 = smov 8   ;;  %s1436_s10 = smov 128  }
  0x5e   : > { %732 = dma.hbm_to_vmem [thread:$0]  (!%p1239_p10), %s1231_s27, 2048, %s1233_s15, %s1243_s8, %s1436_s10, %s1436_s10, %s1435_s6  }
  0x5f   : > { %206 = sbr.rel (%p1185_p8) target bundleno = 409 (0x199), region = 32  ;;  %s1277_s7 = sand.u32 (!%p1185_p8), 1, %s993_s16  }
  0x60   : > { %s590_s9 = sshll.u32 (!%p1185_p8), %s1277_s7, 6  ;;  %s209_s12 = scalar_lea.sflag (!%p1185_p8), [#allocation4], %s1277_s7 }
  0x61   : > { %s212_s26 = scalar_lea.vmem (!%p1185_p8), [#allocation3], %s590_s9  ;;  %p1437_p4 = scmp.ne.s32.totalorder (!%p1185_p8), %s1421_s29, 0 }
  0x66   : > { %964 = dma.done.wait (%p1437_p4), %s209_s12, 1024  }
  0x67   : > { %966 = vsyncadd (%p1437_p4), %s209_s12, 4294966272  ;;  %s217_s15 = sand.u32 1, %s981_s13   ;;  %p1438_p8 = scmp.ne.s32.totalorder %s1431_s23, 0 }
  0x68   : > { %s591_s27 = sshll.u32 %s217_s15, 7  ;;  %s218_s11 = scalar_lea.sflag [#allocation7], %s217_s15 }
  0x69   : > { %s1286_s28 = scalar_lea.vmem [#allocation6], %s591_s27 }
  0x6a   : > { %968 = dma.done.wait (%p1438_p8), %s218_s11, 2048  }
  0x6b   : > { %970 = vsyncadd (%p1438_p8), %s218_s11, 4294965248  ;;  %p253_p10 = scmp.lt.s32.totalorder %s1001_s18, 2  ;;  %s1300_s6 = scalar_lea.vmem [#allocation8], %s590_s9 }
  0x6c   : > { %p593_p6 = scmp.ne.s32.totalorder %s1001_s18, 0 }
  0x6d   : > { %s1294_s8 = scalar_select %p253_p10, %s1001_s18, 2 }
  0x6e   : > { %260 = sbr.rel (%p593_p6) target bundleno = 117 (0x75), region = 44  ;;  %v261_v0 = vld [vmem:[%s212_s26] sm:$0xff] (!%p593_p6)  ;;  %v262_v1 = vld [vmem:[%s212_s26 + $0x8] sm:$0xff] (!%p593_p6)  ;;  %v263_v2 = vld [vmem:[%s212_s26 + $0x10] sm:$0xff] (!%p593_p6) }
  0x6f   : > { %s255_s5 = scalar_lea.vmem %s1405_s2, %s1294_s8  ;;  %269 = vst [vmem:[#allocation2] sm:$0xff] (!%p593_p6), %v261_v0  ;;  %270 = vst [vmem:[#allocation2 + $0x8] sm:$0xff] (!%p593_p6), %v262_v1  ;;  %v264_v3 = vld [vmem:[%s212_s26 + $0x18] sm:$0xff] (!%p593_p6)  ;;  %v265_v4 = vld [vmem:[%s212_s26 + $0x20] sm:$0xff] (!%p593_p6) }
  0x70   : > { %271 = vst [vmem:[#allocation2 + $0x10] sm:$0xff] (!%p593_p6), %v263_v2  ;;  %v266_v5 = vld [vmem:[%s212_s26 + $0x28] sm:$0xff] (!%p593_p6)  ;;  %272 = vst [vmem:[#allocation2 + $0x18] sm:$0xff] (!%p593_p6), %v264_v3  ;;  %v267_v6 = vld [vmem:[%s212_s26 + $0x30] sm:$0xff] (!%p593_p6) }
  0x71   : > { %273 = vst [vmem:[#allocation2 + $0x20] sm:$0xff] (!%p593_p6), %v265_v4  ;;  %274 = vst [vmem:[#allocation2 + $0x28] sm:$0xff] (!%p593_p6), %v266_v5  ;;  %v268_v7 = vld [vmem:[%s212_s26 + $0x38] sm:$0xff] (!%p593_p6) }
  0x72   : > { %275 = vst [vmem:[#allocation2 + $0x30] sm:$0xff] (!%p593_p6), %v267_v6  ;;  %276 = vst [vmem:[#allocation2 + $0x38] sm:$0xff] (!%p593_p6), %v268_v7 }
  0x75 PF: > { %v285_v8 = vld [vmem:[%s1286_s28] sm:$0xff]  ;;  %v286_v9 = vld [vmem:[%s1286_s28 + $0x8] sm:$0xff]  ;;  %v287_v10 = vld [vmem:[%s1286_s28 + $0x10] sm:$0xff]  ;;  %p595_p13 = scmp.ne.s32.totalorder %s1001_s18, 2 }
  0x76   : > { %v672_v11 = vpack.c.bf16 %v286_v9, %v285_v8  ;;  %v288_v12 = vld [vmem:[%s1286_s28 + $0x18] sm:$0xff]  ;;  %v289_v14 = vld [vmem:[%s1286_s28 + $0x20] sm:$0xff]  ;;  %v290_v15 = vld [vmem:[%s1286_s28 + $0x28] sm:$0xff] }
  0x77   : > { %v676_v13 = vpack.c.bf16 %v288_v12, %v287_v10  ;;  %v680_v16 = vpack.c.bf16 %v290_v15, %v289_v14  ;;  %v277_v17 = vld [vmem:[#allocation2] sm:$0xff]  ;;  %v291_v19 = vld [vmem:[%s1286_s28 + $0x30] sm:$0xff]  ;;  %v292_v20 = vld [vmem:[%s1286_s28 + $0x38] sm:$0xff] }
  0x78   : > { %673 = vmatprep.subr.bf16.mxu0 %v672_v11  ;;  %704 = vmatprep.subr.bf16.mxu1 %v672_v11  ;;  %v281_v18 = vld [vmem:[#allocation2 + $0x20] sm:$0xff]  ;;  %v684_v21 = vpack.c.bf16 %v292_v20, %v291_v19  ;;  %v294_v23 = vld [vmem:[%s1286_s28 + $0x48] sm:$0xff]  ;;  %v295_v25 = vld [vmem:[%s1286_s28 + $0x50] sm:$0xff] }
  0x79   : > { %675 = vmatpush3.bf16.msra.mxu0 %v672_v11  ;;  %712 = vmatpush3.bf16.msra.mxu1 %v672_v11  ;;  %v293_v22 = vld [vmem:[%s1286_s28 + $0x40] sm:$0xff]  ;;  %v296_v26 = vld [vmem:[%s1286_s28 + $0x58] sm:$0xff]  ;;  %v298_v29 = vld [vmem:[%s1286_s28 + $0x68] sm:$0xff] }
  0x7a   : > { %677 = vmatprep.subr.bf16.mxu0 %v676_v13  ;;  %705 = vmatprep.subr.bf16.mxu1 %v676_v13  ;;  %v688_v24 = vpack.c.bf16 %v294_v23, %v293_v22  ;;  %v692_v27 = vpack.c.bf16 %v296_v26, %v295_v25  ;;  %v297_v28 = vld [vmem:[%s1286_s28 + $0x60] sm:$0xff]  ;;  %v299_v31 = vld [vmem:[%s1286_s28 + $0x70] sm:$0xff]  ;;  %v300_v32 = vld [vmem:[%s1286_s28 + $0x78] sm:$0xff] }
  0x7b   : > { %660 = vmatprep.mubr.f32.mxu0 %v277_v17  ;;  %666 = vmatprep.mubr.f32.mxu1 %v281_v18  ;;  %v696_v30 = vpack.c.bf16 %v298_v29, %v297_v28  ;;  %v700_v33 = vpack.c.bf16 %v300_v32, %v299_v31  ;;  %v278_v34 = vld [vmem:[#allocation2 + $0x8] sm:$0xff]  ;;  %v279_v36 = vld [vmem:[#allocation2 + $0x10] sm:$0xff]  ;;  %v280_v38 = vld [vmem:[#allocation2 + $0x18] sm:$0xff] }
  0x7c   : > { %v282_v35 = vld [vmem:[#allocation2 + $0x28] sm:$0xff]  ;;  %v283_v37 = vld [vmem:[#allocation2 + $0x30] sm:$0xff]  ;;  %v284_v39 = vld [vmem:[#allocation2 + $0x38] sm:$0xff] }
  0x7d   : > { %679 = vmatpush3.bf16.msra.mxu0 %v676_v13  ;;  %713 = vmatpush3.bf16.msra.mxu1 %v676_v13  ;;  %v594_v40 = vld [vmem:[%s255_s5] ss:$0 sm:$0xff] }
  0x7e   : > { %681 = vmatprep.subr.bf16.mxu0 %v680_v16  ;;  %706 = vmatprep.subr.bf16.mxu1 %v680_v16 }
  0x81   : > { %683 = vmatpush3.bf16.msra.mxu0 %v680_v16  ;;  %714 = vmatpush3.bf16.msra.mxu1 %v680_v16 }
  0x82   : > { %685 = vmatprep.subr.bf16.mxu0 %v684_v21  ;;  %707 = vmatprep.subr.bf16.mxu1 %v684_v21 }
  0x85   : > { %687 = vmatpush3.bf16.msra.mxu0 %v684_v21  ;;  %715 = vmatpush3.bf16.msra.mxu1 %v684_v21 }
  0x86   : > { %689 = vmatprep.subr.bf16.mxu0 %v688_v24  ;;  %708 = vmatprep.subr.bf16.mxu1 %v688_v24 }
  0x89   : > { %691 = vmatpush3.bf16.msra.mxu0 %v688_v24  ;;  %716 = vmatpush3.bf16.msra.mxu1 %v688_v24 }
  0x8a   : > { %693 = vmatprep.subr.bf16.mxu0 %v692_v27  ;;  %709 = vmatprep.subr.bf16.mxu1 %v692_v27 }
  0x8d   : > { %695 = vmatpush3.bf16.msra.mxu0 %v692_v27  ;;  %717 = vmatpush3.bf16.msra.mxu1 %v692_v27 }
  0x8e   : > { %697 = vmatprep.subr.bf16.mxu0 %v696_v30  ;;  %710 = vmatprep.subr.bf16.mxu1 %v696_v30 }
  0x91   : > { %699 = vmatpush3.bf16.msra.mxu0 %v696_v30  ;;  %718 = vmatpush3.bf16.msra.mxu1 %v696_v30 }
  0x92   : > { %701 = vmatprep.subr.bf16.mxu0 %v700_v33  ;;  %711 = vmatprep.subr.bf16.mxu1 %v700_v33 }
  0x95   : > { %703 = vmatpush3.bf16.msra.mxu0 %v700_v33  ;;  %719 = vmatpush3.bf16.msra.mxu1 %v700_v33 }
  0x98   : > { %661 = vmatmul.mubr.f32.vlgmr.msra.gmra.mrb[0].mxu0 %v278_v34  ;;  %667 = vmatmul.mubr.f32.vlgmr.msra.gmra.mrb[0].mxu1 %v282_v35 }
  0x99   : > { %663 = vmatprep.mubr.f32.mxu0 %v279_v36  ;;  %669 = vmatprep.mubr.f32.mxu1 %v283_v37 }
  0x9c   : > { %664 = vmatmul.mubr.f32.gmra.mrb[2].mxu0 %v280_v38  ;;  %670 = vmatmul.mubr.f32.gmra.mrb[2].mxu1 %v284_v39 }
 0x16b   : > { %v662_v41 = vpop.f32.mrb[0].mxu0  ;;  %v668_v42 = vpop.f32.mrb[0].mxu1 }
 0x16c   : > { %v380_v43 = vadd.f32 %v662_v41, %v594_v40  ;;  %v400_v44 = vadd.f32 %v668_v42, %v594_v40  ;;  %v374_v45 = vpop.f32.mrb[1].mxu0  ;;  %v394_v46 = vpop.f32.mrb[1].mxu1 }
 0x16d   : > { %v375_v47 = vadd.f32 %v594_v40, %v374_v45  ;;  %v395_v48 = vadd.f32 %v594_v40, %v394_v46 }
 0x16e   : > { %v414_v49 = vmax.f32 %v380_v43, 0.0  ;;  %v418_v50 = vmax.f32 %v400_v44, 0.0 }
 0x16f   : > { %v413_v51 = vmax.f32 %v375_v47, 0.0  ;;  %v417_v52 = vmax.f32 %v395_v48, 0.0  ;;  %v665_v53 = vpop.f32.mrb[2].mxu0  ;;  %v671_v54 = vpop.f32.mrb[2].mxu1  ;;  %432 = sbr.rel (%p595_p13) target bundleno = 383 (0x17f), region = 48 }
 0x170   : > { %422 = vst [vmem:[#allocation2 + $0x8] sm:$0xff] %v414_v49  ;;  %426 = vst [vmem:[#allocation2 + $0x28] sm:$0xff] %v418_v50  ;;  %v390_v55 = vadd.f32 %v665_v53, %v594_v40  ;;  %v410_v56 = vadd.f32 %v671_v54, %v594_v40  ;;  %v384_v57 = vpop.f32.mrb[3].mxu0  ;;  %v404_v58 = vpop.f32.mrb[3].mxu1 }
 0x171   : > { %421 = vst [vmem:[#allocation2] sm:$0xff] %v413_v51  ;;  %425 = vst [vmem:[#allocation2 + $0x20] sm:$0xff] %v417_v52  ;;  %v385_v59 = vadd.f32 %v594_v40, %v384_v57  ;;  %v405_v60 = vadd.f32 %v594_v40, %v404_v58 }
 0x172   : > { %v416_v61 = vmax.f32 %v390_v55, 0.0  ;;  %v420_v62 = vmax.f32 %v410_v56, 0.0 }
 0x173   : > { %v415_v63 = vmax.f32 %v385_v59, 0.0  ;;  %v419_v0 = vmax.f32 %v405_v60, 0.0 }
 0x174   : > { %424 = vst [vmem:[#allocation2 + $0x18] sm:$0xff] %v416_v61  ;;  %428 = vst [vmem:[#allocation2 + $0x38] sm:$0xff] %v420_v62 }
 0x175   : > { %423 = vst [vmem:[#allocation2 + $0x10] sm:$0xff] %v415_v63  ;;  %427 = vst [vmem:[#allocation2 + $0x30] sm:$0xff] %v419_v0 }
 0x177   : > { %v434_v2 = vld [vmem:[#allocation2 + $0x8] sm:$0xff] }
 0x178   : > { %v433_v1 = vld [vmem:[#allocation2] sm:$0xff]  ;;  %442 = vst [vmem:[%s1300_s6 + $0x8] sm:$0xff] %v434_v2  ;;  %v438_v6 = vld [vmem:[#allocation2 + $0x28] sm:$0xff] }
 0x179   : > { %441 = vst [vmem:[%s1300_s6] sm:$0xff] %v433_v1  ;;  %v437_v5 = vld [vmem:[#allocation2 + $0x20] sm:$0xff]  ;;  %446 = vst [vmem:[%s1300_s6 + $0x28] sm:$0xff] %v438_v6 }
 0x17a   : > { %445 = vst [vmem:[%s1300_s6 + $0x20] sm:$0xff] %v437_v5 }
 0x17b   : > { %v436_v4 = vld [vmem:[#allocation2 + $0x18] sm:$0xff] }
 0x17c   : > { %v435_v3 = vld [vmem:[#allocation2 + $0x10] sm:$0xff]  ;;  %444 = vst [vmem:[%s1300_s6 + $0x18] sm:$0xff] %v436_v4  ;;  %v440_v8 = vld [vmem:[#allocation2 + $0x38] sm:$0xff] }
 0x17d   : > { %443 = vst [vmem:[%s1300_s6 + $0x10] sm:$0xff] %v435_v3  ;;  %v439_v7 = vld [vmem:[#allocation2 + $0x30] sm:$0xff]  ;;  %448 = vst [vmem:[%s1300_s6 + $0x38] sm:$0xff] %v440_v8 }
 0x17e   : > { %447 = vst [vmem:[%s1300_s6 + $0x30] sm:$0xff] %v439_v7 }
 0x17f PF: > { %s603_s18 = sshll.u32 %s1005_s19, 10  ;;  %s463_s15 = sshll.u32 %s1300_s6, 4  ;;  %s1340_s15 = int_to_ptr.vmem [resolvable:$true] %s463_s15 }
 0x180   : > { %s1337_s26 = scalar_lea.hbm %s1406_s3, %s603_s18  ;;  %s450_s27 = scalar_lea.sflag [#allocation5], %s1277_s7 }
 0x181   : > { %s891_s11 = scalar_lea.vmem %s1340_s15, 1024  ;;  %p1439_p0 = scmp.ne.s32.totalorder %s1422_s30, 0 }
 0x182   : > { %p892_p12 = scmp.ne.s32.totalorder %s1340_s15, %s891_s11  ;;  %s1023_s28 = smov [#allocation8]  }
 0x183   : > { %s895_s8 = sshll.u32 %s1023_s28, 4  ;;  %s896_s8 = int_to_ptr.vmem [resolvable:$false] %s895_s8 }
 0x184   : > { %p893_p5 = pnand %p892_p12, %p1439_p0  ;;  %s897_s19 = scalar_lea.vmem %s896_s8, 2048 }
 0x185   : > { %p898_p1 = scmp.lt.s32.totalorder %s1340_s15, %s896_s8  ;;  %p899_p9 = scmp.lt.s32.totalorder %s897_s19, %s891_s11 }
 0x186   : > { %p894_p3 = pneg %p893_p5 }
 0x187   : > { %p900_p2 = por %p899_p9, %p898_p1 }
 0x189   : > { %p901_p11 = pnand %p900_p2, %p894_p3 }
 0x18b   : > { %904 = shalt.err (!%p901_p11)
}
 0x18c   : > { %s905_s29 = scalar_lea.hbm %s1337_s26, 1024  ;;  %s909_s6 = scalar_lea.hbm %s1406_s3, 2048 }
 0x18d   : > { %p906_p7 = scmp.ne.s32.totalorder %s1337_s26, %s905_s29  ;;  %p910_p10 = scmp.lt.u32.totalorder %s1337_s26, %s1406_s3 }
 0x18e   : > { %p911_p6 = scmp.lt.u32.totalorder %s909_s6, %s905_s29  ;;  %p913_p12 = scmp.lt.u32.totalorder %s905_s29, %s1337_s26 }
 0x18f   : > { %p907_p4 = pnand %p906_p7, %p1439_p0 }
 0x190   : > { %p912_p13 = por %p911_p6, %p910_p10 }
 0x191   : > { %p908_p8 = pneg %p907_p4 }
 0x192   : > { %p914_p5 = por %p913_p12, %p912_p13 }
 0x194   : > { %p915_p3 = pnand %p914_p5, %p908_p8 }
 0x196   : > { %918 = shalt.err (!%p915_p3)
}
 0x197   : > { %s1024_s18 = smov 128   ;;  %s1025_s9 = smov 8  }
 0x198   : > { %724 = dma.vmem_to_hbm [thread:$0]  (%p1439_p0), %s1340_s15, 1024, %s1337_s26, %s450_s27, %s1024_s18, %s1024_s18, %s1025_s9  }
 0x199 PF: > { %s1440_s12 = sld [smem:[#allocation12_spill]]  ;;  %s1441_s11 = sld [smem:[#allocation13_spill]] }
 0x19a   : > { %p738_p1 = scmp.ge.s32.totalorder %s1017_s22, 2 }
 0x19f   : > { %s478_s28 = sand.u32 1, %s1440_s12   ;;  %p1442_p9 = scmp.ne.s32.totalorder %s1441_s11, 0 }
 0x1a0   : > { %s479_s8 = scalar_lea.sflag [#allocation5], %s478_s28 }
 0x1a1   : > { %p734_p2 = pnand %p738_p1, %p1442_p9 }
 0x1a3   : > { %972 = dma.done.wait (!%p734_p2), %s479_s8, 1024  }
 0x1a4   : > { %974 = vsyncadd (!%p734_p2), %s479_s8, 4294966272  ;;  %s22_s22 = sadd.s32 1, %s1017_s22   ;;  %s1443_s30 = sld [smem:[#allocation14_spill]] }
 0x1a5   : > { %p19_p11 = scmp.ge.s32.totalorder %s22_s22, 8   ;;  %s1444_s12 = smov %s981_s13 }
 0x1a6   : > { %s1445_s13 = smov %s985_s14  ;;  %s1446_s14 = smov %s1218_s24 }
 0x1a7   : > { %s1447_s15 = smov %s993_s16  ;;  %s1448_s16 = smov %s997_s17 }
 0x1a8   : > { %s1449_s17 = smov %s1226_s0  ;;  %s1450_s18 = smov %s1009_s20 }
 0x1a9   : > { %s1451_s19 = smov %s1013_s21  ;;  %s1453_s21 = smov %s1459_s25 }
 0x1aa   : > { %s1452_s20 = smov %s1443_s30  ;;  %21 = sbr.rel (!%p19_p11) target bundleno = 13 (0xd), region = 101 }
 0x1b1   :  { %484 = vsyncpa [#allocation4], 1 }
 0x1b2   :  { %486 = vsyncpa [#allocation4 + $0x1], 1 }
 0x1b3   :  { %487 = vsyncpa [#allocation7], 1 }
 0x1b4   :  { %489 = vsyncpa [#allocation7 + $0x1], 1 }
 0x1b5   :  { %490 = vsyncpa [#allocation5], 1 }
 0x1b6   :  { %492 = vsyncpa [#allocation5 + $0x1], 1 }

</bundles_post_ra>
